<compile_context>
chip_gen: v5e
topology: v5e:2x2
jax: 0.10.0
libtpu: 0.0.40
codegen_flags: <defaults>
</compile_context>

<pallas_src>
import jax
import jax.numpy as jnp
from jax import lax
from jax.experimental import pallas as pl
from jax.experimental.pallas import tpu as pltpu


def _round_up(a, b):
    return (a + b - 1) // b * b


# ---------------------------------------------------------------------------
# One-time (parameter-load-time) weight preparation.
# ---------------------------------------------------------------------------
def prepare_final_head_weights(wk, wv):
    """Pre-transpose the two nn.Linear weights ((out, in) layout) and fuse them
    into a single (D, 2D) operand: columns [0, D) produce k, [D, 2D) produce v.
    Done once at load time, not per forward call."""
    d_out, d_in = wk.shape
    assert wk.shape == wv.shape == (d_out, d_in)
    return jnp.concatenate([wk.T, wv.T], axis=1)          # (D_in, 2*D_out)


# ---------------------------------------------------------------------------
# Kernels.
# ---------------------------------------------------------------------------
def _kv_flat_kernel(x_ref, w_ref, k_ref, v_ref):
    # x_ref: (tm, D); w_ref: (D, 2D) pre-transposed; k_ref/v_ref: (tm, D).
    d = k_ref.shape[-1]
    x = x_ref[...]
    dn = (((1,), (0,)), ((), ()))
    # Two dots against static halves of the resident weight; each MXU result
    # goes straight into its output ref (no (tm, 2D) f32 slab + slice).
    k_ref[...] = lax.dot_general(
        x, w_ref[:, :d], dimension_numbers=dn,
        preferred_element_type=jnp.float32).astype(k_ref.dtype)
    v_ref[...] = lax.dot_general(
        x, w_ref[:, d:], dimension_numbers=dn,
        preferred_element_type=jnp.float32).astype(v_ref.dtype)


def _kv_heads_kernel(x_ref, w_ref, k_ref, v_ref):
    # Head-major variant (used when dk % 128 == 0).
    # x_ref: (1, ts, D); w_ref: (D, 2D); k_ref/v_ref: (1, h, ts, dk).
    h = k_ref.shape[1]
    dk = k_ref.shape[3]
    d = x_ref.shape[2]
    x = x_ref[0]
    dn = (((1,), (0,)), ((), ()))
    for i in range(h):                                     # static unroll over heads
        k_ref[0, i] = lax.dot_general(
            x, w_ref[:, i * dk:(i + 1) * dk], dimension_numbers=dn,
            preferred_element_type=jnp.float32).astype(k_ref.dtype)
        v_ref[0, i] = lax.dot_general(
            x, w_ref[:, d + i * dk:d + (i + 1) * dk], dimension_numbers=dn,
            preferred_element_type=jnp.float32).astype(v_ref.dtype)


# ---------------------------------------------------------------------------
# VMEM sizing: always set an explicit limit; shrink the row tile (never clamp
# the limit below the estimate) if the plan does not fit the device budget.
# ---------------------------------------------------------------------------
def _choose_rows_and_vmem_limit(rows, d, x_itemsize, w_itemsize):
    try:
        phys = pltpu.get_tpu_info().vmem_capacity_bytes
    except Exception:
        phys = 64 * 1024 * 1024                  # conservative: v7x per-TC VMEM
    cap = max(phys - 16 * 1024 * 1024, 24 * 1024 * 1024)   # leave compiler headroom

    def est(r):
        w = 2 * (2 * d * d * w_itemsize)         # fused weight incl. pipeline double-buffer
        xb = 2 * r * d * x_itemsize              # streamed x tile, double-buffered
        ob = 2 * 2 * r * d * x_itemsize          # k + v output tiles, double-buffered
        acc = 2 * r * d * 4                      # f32 MXU results before the cast
        return w + xb + ob + acc

    while est(rows) > cap and rows > 64:
        rows = max(_round_up(rows // 2, 8), 8)
    limit = int(min(cap, max(est(rows) * 5 // 4, 32 * 1024 * 1024)))
    return rows, limit


def _pick_row_tile(dim, tile):
    if dim % 8 == 0:
        return min(_round_up(tile, 8), dim)
    return dim if dim <= tile else _round_up(tile, 8)


# ---------------------------------------------------------------------------
# Forward wrapper (== FinalHead.forward).
# ---------------------------------------------------------------------------
def final_head(x, w_kv, h, *, tile_m=512, tile_s=256):
    """x: (B, S, D); w_kv: (D, 2D) from prepare_final_head_weights.
    Returns (k, v), each (B, h, S, D // h) -- same as the PyTorch FinalHead."""
    B, S, D = x.shape
    assert w_kv.shape == (D, 2 * D)
    assert D % h == 0
    dk = D // h
    if dk % 128 == 0:
        return _final_head_headmajor(x, w_kv, h, dk, tile_s)
    return _final_head_flat(x, w_kv, h, dk, tile_m)


def _final_head_flat(x, w_kv, h, dk, tile_m):
    """dk < 128: lane-dense D-major kernel stores, head split done outside."""
    B, S, D = x.shape
    M = B * S
    x2 = x.reshape(M, D)                         # free row-major collapse

    tm = _pick_row_tile(M, tile_m)
    tm, vmem_limit = _choose_rows_and_vmem_limit(tm, D, x.dtype.itemsize,
                                                 w_kv.dtype.itemsize)
    grid_m = pl.cdiv(M, tm)                      # ragged last block: no pad/slice passes

    k_flat, v_flat = pl.pallas_call(
        _kv_flat_kernel,
        out_shape=(jax.ShapeDtypeStruct((M, D), x.dtype),
                   jax.ShapeDtypeStruct((M, D), x.dtype)),
        grid=(grid_m,),
        in_specs=[
            pl.BlockSpec((tm, D), lambda m: (m, 0)),       # x tile (streamed)
            pl.BlockSpec((D, 2 * D), lambda m: (0, 0)),    # fused weight (resident)
        ],
        out_specs=(
            pl.BlockSpec((tm, D), lambda m: (m, 0)),       # k tile
            pl.BlockSpec((tm, D), lambda m: (m, 0)),       # v tile
        ),
        compiler_params=pltpu.CompilerParams(
            dimension_semantics=("parallel",),
            vmem_limit_bytes=vmem_limit),
    )(x2, w_kv)

    k = k_flat.reshape(B, S, h, dk).transpose(0, 2, 1, 3)
    v = v_flat.reshape(B, S, h, dk).transpose(0, 2, 1, 3)
    return k, v


def _final_head_headmajor(x, w_kv, h, dk, tile_s):
    """dk % 128 == 0: emit (B, h, S, dk) directly; no post-kernel transpose."""
    B, S, D = x.shape

    ts = _pick_row_tile(S, tile_s)
    ts, vmem_limit = _choose_rows_and_vmem_limit(ts, D, x.dtype.itemsize,
                                                 w_kv.dtype.itemsize)
    grid = (B, pl.cdiv(S, ts))

    k, v = pl.pallas_call(
        _kv_heads_kernel,
        out_shape=(jax.ShapeDtypeStruct((B, h, S, dk), x.dtype),
                   jax.ShapeDtypeStruct((B, h, S, dk), x.dtype)),
        grid=grid,
        in_specs=[
            pl.BlockSpec((1, ts, D), lambda b, s: (b, s, 0)),       # x tile
            pl.BlockSpec((D, 2 * D), lambda b, s: (0, 0)),          # fused weight
        ],
        out_specs=(
            pl.BlockSpec((1, h, ts, dk), lambda b, s: (b, 0, s, 0)),  # k head-major
            pl.BlockSpec((1, h, ts, dk), lambda b, s: (b, 0, s, 0)),  # v head-major
        ),
        compiler_params=pltpu.CompilerParams(
            dimension_semantics=("parallel", "parallel"),
            vmem_limit_bytes=vmem_limit),
    )(x, w_kv)
    return k, v


# ---------------------------------------------------------------------------
# Self-test.
# ---------------------------------------------------------------------------
if __name__ == "__main__":
    def reference(x, wk, wv, h):
        B, S, D = x.shape
        dk = D // h
        k = jnp.einsum("bsd,od->bso", x, wk, precision=lax.Precision.HIGHEST)
        v = jnp.einsum("bsd,od->bso", x, wv, precision=lax.Precision.HIGHEST)
        return (k.reshape(B, S, h, dk).transpose(0, 2, 1, 3),
                v.reshape(B, S, h, dk).transpose(0, 2, 1, 3))

    key = jax.random.PRNGKey(0)

    # Case 1: dk < 128 -> flat kernel + outside head split.
    B, S, D, H = 2, 8, 128, 4
    k1, k2, k3, key = jax.random.split(key, 4)
    x = jax.random.normal(k1, (B, S, D), dtype=jnp.float32)
    wk = jax.random.normal(k2, (D, D), dtype=jnp.float32) * 0.05
    wv = jax.random.normal(k3, (D, D), dtype=jnp.float32) * 0.05
    w_kv = prepare_final_head_weights(wk, wv)        # one-time load-time prep
    k_out, v_out = final_head(x, w_kv, H)
    jax.block_until_ready((k_out, v_out))
    k_ref, v_ref = reference(x, wk, wv, H)
    assert k_out.shape == (B, H, S, D // H) and v_out.shape == (B, H, S, D // H)
    assert jnp.allclose(k_out, k_ref, atol=3e-3, rtol=3e-3)
    assert jnp.allclose(v_out, v_ref, atol=3e-3, rtol=3e-3)

    # Case 2: dk == 128 -> head-major kernel writes (B, h, S, dk) directly.
    B, S, D, H = 2, 8, 512, 4
    k1, k2, k3, key = jax.random.split(key, 4)
    x = jax.random.normal(k1, (B, S, D), dtype=jnp.float32)
    wk = jax.random.normal(k2, (D, D), dtype=jnp.float32) * 0.03
    wv = jax.random.normal(k3, (D, D), dtype=jnp.float32) * 0.03
    w_kv = prepare_final_head_weights(wk, wv)
    k_out, v_out = final_head(x, w_kv, H)
    jax.block_until_ready((k_out, v_out))
    k_ref, v_ref = reference(x, wk, wv, H)
    assert k_out.shape == (B, H, S, D // H) and v_out.shape == (B, H, S, D // H)
    assert jnp.allclose(k_out, k_ref, atol=3e-3, rtol=3e-3)
    assert jnp.allclose(v_out, v_ref, atol=3e-3, rtol=3e-3)

    print("KERNEL_OK")
</pallas_src>

<mosaic_0001>
module attributes {stable_mosaic.version = 11 : i64} {
  func.func @_kv_flat_kernel(%arg0: i32, %arg1: memref<16x128xf32, #tpu.memory_space<vmem>>, %arg2: memref<128x256xf32, #tpu.memory_space<vmem>>, %arg3: memref<16x128xf32, #tpu.memory_space<vmem>>, %arg4: memref<16x128xf32, #tpu.memory_space<vmem>>) attributes {dimension_semantics = [#tpu.dimension_semantics<parallel>], iteration_bounds = array<i64: 1>, scalar_prefetch = 0 : i64, scratch_operands = 0 : i64, tpu.core_type = #tpu.core_type<tc>, window_params = [{transform_indices = @transform_0, window_bounds = array<i64: 16, 128>}, {pipeline_mode = #tpu.pipeline_mode<synchronous>, transform_indices = @transform_1, window_bounds = array<i64: 128, 256>}, {transform_indices = @transform_2, window_bounds = array<i64: 16, 128>}, {transform_indices = @transform_3, window_bounds = array<i64: 16, 128>}]} {
    %c0 = arith.constant 0 : index
    %c0_0 = arith.constant 0 : index
    %0 = vector.load %arg1[%c0, %c0_0] : memref<16x128xf32, #tpu.memory_space<vmem>>, vector<16x128xf32>
    %c0_1 = arith.constant 0 : index
    %c0_2 = arith.constant 0 : index
    %1 = vector.load %arg2[%c0_1, %c0_2] : memref<128x256xf32, #tpu.memory_space<vmem>>, vector<128x128xf32>
    %cst = arith.constant dense<0.000000e+00> : vector<16x128xf32>
    %2 = tpu.matmul %0, %1, %cst {dimension_numbers = #tpu.dot_dimension_numbers<[1], [0], [0], [1], [0, 0, 1, 1], [], []>} : vector<16x128xf32>, vector<128x128xf32>, vector<16x128xf32> -> vector<16x128xf32>
    %c0_3 = arith.constant 0 : index
    %c0_4 = arith.constant 0 : index
    %3 = vector.load %arg3[%c0_3, %c0_4] : memref<16x128xf32, #tpu.memory_space<vmem>>, vector<16x128xf32>
    tpu.vector_store %arg3[%c0_3, %c0_4], %2 {strides = array<i32>} : memref<16x128xf32, #tpu.memory_space<vmem>>, vector<16x128xf32>,
    %c0_5 = arith.constant 0 : index
    %c128 = arith.constant 128 : index
    %4 = vector.load %arg2[%c0_5, %c128] : memref<128x256xf32, #tpu.memory_space<vmem>>, vector<128x128xf32>
    %cst_6 = arith.constant dense<0.000000e+00> : vector<16x128xf32>
    %5 = tpu.matmul %0, %4, %cst_6 {dimension_numbers = #tpu.dot_dimension_numbers<[1], [0], [0], [1], [0, 0, 1, 1], [], []>} : vector<16x128xf32>, vector<128x128xf32>, vector<16x128xf32> -> vector<16x128xf32>
    %c0_7 = arith.constant 0 : index
    %c0_8 = arith.constant 0 : index
    %6 = vector.load %arg4[%c0_7, %c0_8] : memref<16x128xf32, #tpu.memory_space<vmem>>, vector<16x128xf32>
    tpu.vector_store %arg4[%c0_7, %c0_8], %5 {strides = array<i32>} : memref<16x128xf32, #tpu.memory_space<vmem>>, vector<16x128xf32>,
    return
  }
  func.func @transform_0(%arg0: i32) -> (i32, i32) {
    %c0_i32 = arith.constant 0 : i32
    %c0_i32_0 = arith.constant 0 : i32
    return %arg0, %c0_i32 : i32, i32
  }
  func.func @transform_1(%arg0: i32) -> (i32, i32) {
    %c0_i32 = arith.constant 0 : i32
    %c0_i32_0 = arith.constant 0 : i32
    %c0_i32_1 = arith.constant 0 : i32
    return %c0_i32, %c0_i32_0 : i32, i32
  }
  func.func @transform_2(%arg0: i32) -> (i32, i32) {
    %c0_i32 = arith.constant 0 : i32
    %c0_i32_0 = arith.constant 0 : i32
    return %arg0, %c0_i32 : i32, i32
  }
  func.func @transform_3(%arg0: i32) -> (i32, i32) {
    %c0_i32 = arith.constant 0 : i32
    %c0_i32_0 = arith.constant 0 : i32
    return %arg0, %c0_i32 : i32, i32
  }
}

</mosaic_0001>

<bundles_post_ra>
// kernel: tpu_custom_call.1
= control target key start
LH: loop header
LB: loop body
LE: loop exit
PB: predicated region body
PF: predicated region fallthrough
CT: control target
= control target key end

     0   :  { %9 = vsyncpa [#allocation3], 0  ;;  %s362_s0 = inlined_call_operand.hbm [shape: f32[16,128], index: 0, kind: input, shape index: {}]   ;;  %s363_s1 = inlined_call_operand.hbm [shape: f32[128,256], index: 1, kind: input, shape index: {}]   ;;  %s364_s2 = inlined_call_operand.hbm [shape: f32[16,128], index: 2, kind: output, shape index: {0}]   ;;  %s365_s3 = inlined_call_operand.hbm [shape: f32[16,128], index: 3, kind: output, shape index: {1}]  }
   0x1   :  { %10 = vsyncpa [#allocation6], 0 }
   0x2   :  { %11 = vsyncpa [#allocation4], 0 }
   0x3   :  { %12 = vsyncpa [#allocation9], 0  ;;  %s17_s14 = sshll.u32 %s362_s0, 4  ;;  %s313_s15 = smov [#allocation2]   ;;  %s18_s14 = int_to_ptr.hbm [resolvable:$true] %s17_s14 }
   0x4   :  { %s19_s16 = sshll.u32 %s313_s15, 4  ;;  %s30_s19 = sshll.u32 %s363_s1, 4  ;;  %s20_s16 = int_to_ptr.vmem [resolvable:$true] %s19_s16  ;;  %s31_s19 = int_to_ptr.hbm [resolvable:$true] %s30_s19 }
   0x5   :  { %s314_s20 = smov 128   ;;  %s315_s21 = smov 8  }
   0x6   :  { %25 = dma.hbm_to_vmem [thread:$0]  %s18_s14, 256, %s20_s16, [#allocation3], %s314_s20, %s314_s20, %s315_s21  }
   0x7   :  { %s316_s22 = smov [#allocation5]   ;;  %s317_s24 = smov 256  }
   0x8   :  { %s32_s23 = sshll.u32 %s316_s22, 4  ;;  %s318_s0 = smov 16   ;;  %s33_s23 = int_to_ptr.vmem [resolvable:$true] %s32_s23 }
   0x9   :  { %38 = dma.hbm_to_vmem [thread:$0]  %s31_s19, 4096, %s33_s23, [#allocation6], %s317_s24, %s317_s24, %s318_s0  }
   0xa   :  { %305 = dma.done.wait [#allocation3], 256  }
   0xb   :  { %306 = vsyncadd [#allocation3], 4294967040 }
   0xc   :  { %307 = dma.done.wait [#allocation6], 4096  }
   0xd   :  { %308 = vsyncadd [#allocation6], 4294963200  ;;  %v64_v0 = vld [vmem:[#allocation5 + $0xf0] sm:$0xff]  ;;  %v105_v1 = vld [vmem:[#allocation5 + $0xf8] sm:$0xff]  ;;  %s319_s1 = smov [#allocation7]   ;;  %s137_s28 = sshll.u32 %s364_s2, 4  ;;  %s138_s28 = int_to_ptr.hbm [resolvable:$true] %s137_s28 }
   0xe   :  { %v63_v2 = vld [vmem:[#allocation5 + $0xe0] sm:$0xff]  ;;  %169 = vmatpush.msra.mxu2 %v64_v0  ;;  %185 = vmatpush.msra.mxu3 %v105_v1  ;;  %v104_v3 = vld [vmem:[#allocation5 + $0xe8] sm:$0xff]  ;;  %v62_v4 = vld [vmem:[#allocation5 + $0xd0] sm:$0xff]  ;;  %s135_s25 = sshll.u32 %s319_s1, 4  ;;  %s320_s29 = smov [#allocation8]   ;;  %s136_s25 = int_to_ptr.vmem [resolvable:$true] %s135_s25 }
   0xf   :  { %v103_v5 = vld [vmem:[#allocation5 + $0xd8] sm:$0xff]  ;;  %65 = vmatpush.msra.mxu0 %v64_v0  ;;  %106 = vmatpush.msra.mxu1 %v105_v1  ;;  %v61_v6 = vld [vmem:[#allocation5 + $0xc0] sm:$0xff]  ;;  %v102_v7 = vld [vmem:[#allocation5 + $0xc8] sm:$0xff]  ;;  %s148_s30 = sshll.u32 %s320_s29, 4  ;;  %s150_s6 = sshll.u32 %s365_s3, 4  ;;  %s149_s30 = int_to_ptr.vmem [resolvable:$true] %s148_s30  ;;  %s151_s6 = int_to_ptr.hbm [resolvable:$true] %s150_s6 }
  0x10   :  { %170 = vmatpush.msra.mxu2 %v63_v2  ;;  %186 = vmatpush.msra.mxu3 %v104_v3  ;;  %v60_v8 = vld [vmem:[#allocation5 + $0xb0] sm:$0xff]  ;;  %v101_v9 = vld [vmem:[#allocation5 + $0xb8] sm:$0xff]  ;;  %v59_v10 = vld [vmem:[#allocation5 + $0xa0] sm:$0xff] }
  0x11   :  { %66 = vmatpush.msra.mxu0 %v63_v2  ;;  %107 = vmatpush.msra.mxu1 %v104_v3  ;;  %v100_v11 = vld [vmem:[#allocation5 + $0xa8] sm:$0xff]  ;;  %v58_v12 = vld [vmem:[#allocation5 + $0x90] sm:$0xff]  ;;  %v99_v13 = vld [vmem:[#allocation5 + $0x98] sm:$0xff] }
  0x12   :  { %171 = vmatpush.msra.mxu2 %v62_v4  ;;  %187 = vmatpush.msra.mxu3 %v103_v5  ;;  %v57_v14 = vld [vmem:[#allocation5 + $0x80] sm:$0xff]  ;;  %v98_v15 = vld [vmem:[#allocation5 + $0x88] sm:$0xff]  ;;  %v56_v16 = vld [vmem:[#allocation5 + $0x70] sm:$0xff] }
  0x13   :  { %67 = vmatpush.msra.mxu0 %v62_v4  ;;  %108 = vmatpush.msra.mxu1 %v103_v5  ;;  %v97_v17 = vld [vmem:[#allocation5 + $0x78] sm:$0xff]  ;;  %v55_v18 = vld [vmem:[#allocation5 + $0x60] sm:$0xff]  ;;  %v96_v19 = vld [vmem:[#allocation5 + $0x68] sm:$0xff] }
  0x14   :  { %172 = vmatpush.msra.mxu2 %v61_v6  ;;  %188 = vmatpush.msra.mxu3 %v102_v7  ;;  %v54_v20 = vld [vmem:[#allocation5 + $0x50] sm:$0xff]  ;;  %v95_v21 = vld [vmem:[#allocation5 + $0x58] sm:$0xff]  ;;  %v53_v22 = vld [vmem:[#allocation5 + $0x40] sm:$0xff] }
  0x15   :  { %68 = vmatpush.msra.mxu0 %v61_v6  ;;  %109 = vmatpush.msra.mxu1 %v102_v7  ;;  %v94_v23 = vld [vmem:[#allocation5 + $0x48] sm:$0xff]  ;;  %v52_v24 = vld [vmem:[#allocation5 + $0x30] sm:$0xff]  ;;  %v93_v25 = vld [vmem:[#allocation5 + $0x38] sm:$0xff] }
  0x16   :  { %173 = vmatpush.msra.mxu2 %v60_v8  ;;  %189 = vmatpush.msra.mxu3 %v101_v9  ;;  %v51_v26 = vld [vmem:[#allocation5 + $0x20] sm:$0xff]  ;;  %v92_v27 = vld [vmem:[#allocation5 + $0x28] sm:$0xff]  ;;  %v50_v28 = vld [vmem:[#allocation5 + $0x10] sm:$0xff] }
  0x17   :  { %69 = vmatpush.msra.mxu0 %v60_v8  ;;  %110 = vmatpush.msra.mxu1 %v101_v9  ;;  %v91_v29 = vld [vmem:[#allocation5 + $0x18] sm:$0xff]  ;;  %v49_v30 = vld [vmem:[#allocation5] sm:$0xff]  ;;  %v90_v31 = vld [vmem:[#allocation5 + $0x8] sm:$0xff] }
  0x18   :  { %174 = vmatpush.msra.mxu2 %v59_v10  ;;  %190 = vmatpush.msra.mxu3 %v100_v11  ;;  %v48_v32 = vld [vmem:[#allocation2 + $0x8] sm:$0xff]  ;;  %v47_v33 = vld [vmem:[#allocation2] sm:$0xff] }
  0x19   :  { %70 = vmatpush.msra.mxu0 %v59_v10  ;;  %111 = vmatpush.msra.mxu1 %v100_v11 }
  0x1a   :  { %175 = vmatpush.msra.mxu2 %v58_v12  ;;  %191 = vmatpush.msra.mxu3 %v99_v13 }
  0x1b   :  { %71 = vmatpush.msra.mxu0 %v58_v12  ;;  %112 = vmatpush.msra.mxu1 %v99_v13 }
  0x1c   :  { %176 = vmatpush.msra.mxu2 %v57_v14  ;;  %192 = vmatpush.msra.mxu3 %v98_v15 }
  0x1d   :  { %72 = vmatpush.msra.mxu0 %v57_v14  ;;  %113 = vmatpush.msra.mxu1 %v98_v15 }
  0x1e   :  { %177 = vmatpush.msra.mxu2 %v56_v16  ;;  %193 = vmatpush.msra.mxu3 %v97_v17 }
  0x1f   :  { %73 = vmatpush.msra.mxu0 %v56_v16  ;;  %114 = vmatpush.msra.mxu1 %v97_v17 }
  0x20   :  { %178 = vmatpush.msra.mxu2 %v55_v18  ;;  %194 = vmatpush.msra.mxu3 %v96_v19 }
  0x21   :  { %74 = vmatpush.msra.mxu0 %v55_v18  ;;  %115 = vmatpush.msra.mxu1 %v96_v19 }
  0x22   :  { %179 = vmatpush.msra.mxu2 %v54_v20  ;;  %195 = vmatpush.msra.mxu3 %v95_v21 }
  0x23   :  { %75 = vmatpush.msra.mxu0 %v54_v20  ;;  %116 = vmatpush.msra.mxu1 %v95_v21 }
  0x24   :  { %180 = vmatpush.msra.mxu2 %v53_v22  ;;  %196 = vmatpush.msra.mxu3 %v94_v23 }
  0x25   :  { %76 = vmatpush.msra.mxu0 %v53_v22  ;;  %117 = vmatpush.msra.mxu1 %v94_v23 }
  0x26   :  { %181 = vmatpush.msra.mxu2 %v52_v24  ;;  %197 = vmatpush.msra.mxu3 %v93_v25 }
  0x27   :  { %77 = vmatpush.msra.mxu0 %v52_v24  ;;  %118 = vmatpush.msra.mxu1 %v93_v25 }
  0x28   :  { %182 = vmatpush.msra.mxu2 %v51_v26  ;;  %198 = vmatpush.msra.mxu3 %v92_v27 }
  0x29   :  { %78 = vmatpush.msra.mxu0 %v51_v26  ;;  %119 = vmatpush.msra.mxu1 %v92_v27 }
  0x2a   :  { %183 = vmatpush.msra.mxu2 %v50_v28  ;;  %199 = vmatpush.msra.mxu3 %v91_v29 }
  0x2b   :  { %79 = vmatpush.msra.mxu0 %v50_v28  ;;  %120 = vmatpush.msra.mxu1 %v91_v29 }
  0x2c   :  { %184 = vmatpush.msra.mxu2 %v49_v30  ;;  %200 = vmatpush.msra.mxu3 %v90_v31 }
  0x2d   :  { %84 = vmatmul.f32.vlgmr.msra.gmra.mxu2 %v48_v32  ;;  %125 = vmatmul.f32.vlgmr.msra.gmra.mxu3 %v48_v32 }
  0x2e   :  { %80 = vmatpush.msra.mxu0 %v49_v30  ;;  %121 = vmatpush.msra.mxu1 %v90_v31 }
  0x2f   :  { %81 = vmatmul.f32.vlgmr.msra.gmra.mxu0 %v47_v33  ;;  %122 = vmatmul.f32.vlgmr.msra.gmra.mxu1 %v47_v33 }
  0xac   :  { %v82_v34 = vpop.f32.mrf.mxu0  ;;  %v123_v35 = vpop.f32.mrf.mxu1 }
  0xad   :  { %88 = vst [vmem:[#allocation7] sm:$0xff] %v82_v34 }
  0xae   :  { %129 = vst [vmem:[#allocation8] sm:$0xff] %v123_v35 }
  0xb0   :  { %v85_v36 = vpop.f32.mrf.mxu2  ;;  %v126_v37 = vpop.f32.mrf.mxu3 }
  0xb1   :  { %89 = vst [vmem:[#allocation7 + $0x8] sm:$0xff] %v85_v36 }
  0xb2   :  { %130 = vst [vmem:[#allocation8 + $0x8] sm:$0xff] %v126_v37  ;;  %143 = dma.vmem_to_hbm [thread:$0]  %s136_s25, 256, %s138_s28, [#allocation4], %s314_s20, %s314_s20, %s315_s21  }
  0xb3   :  { %156 = dma.vmem_to_hbm [thread:$0]  %s149_s30, 256, %s151_s6, [#allocation9], %s314_s20, %s314_s20, %s315_s21  }
  0xb4   :  { %309 = dma.done.wait [#allocation4], 256  }
  0xb5   :  { %310 = vsyncadd [#allocation4], 4294967040 }
  0xb6   :  { %311 = dma.done.wait [#allocation9], 256  }
  0xb7   :  { %312 = vsyncadd [#allocation9], 4294967040 }
  0xb8   :  { %165 = vsyncpa [#allocation3], 1 }
  0xb9   :  { %166 = vsyncpa [#allocation6], 1 }
  0xba   :  { %167 = vsyncpa [#allocation4], 1 }
  0xbb   :  { %168 = vsyncpa [#allocation9], 1 }

</bundles_post_ra>
